<compile_context>
chip_gen: v7x
topology: tpu7x:2x2x1
jax: 0.10.0
libtpu: 0.0.40
codegen_flags: <defaults>
</compile_context>

<pallas_src>
import jax
import jax.numpy as jnp
import numpy as np
from jax.experimental import pallas as pl
from jax.experimental.pallas import tpu as pltpu

EPS = 1e-5
NUM_GROUPS = 32


def _fsm_kernel(x_ref, wa_ref, wc_ref, g1_ref, g2_ref, out_ref):
    # x_ref : (NB, HW, Cin)   NB samples per grid step
    # wa_ref: (Cin, Cin)      conv_atten weight, transposed to (in, out)
    # wc_ref: (Cin, Cout)     conv weight, transposed to (in, out)
    # g1_ref: (Cin, Cin)      within-group averaging matrix for GN1  (g @ g.T / cg1)
    # g2_ref: (Cout, Cout)    within-group averaging matrix for GN2  (g @ g.T / cg2)
    x = x_ref[...]                                   # (NB, HW, Cin), f32
    nb, hw, _ = x.shape

    # ---- global average pool over spatial (avg_pool2d with full kernel) ----
    pooled = jnp.sum(x, axis=1) * (1.0 / hw)         # (NB, Cin)

    # ---- 1x1 conv_atten (no bias) ----
    a = jnp.dot(pooled, wa_ref[...], preferred_element_type=jnp.float32)   # (NB, Cin)

    # ---- GroupNorm1 on (NB, Cin, 1, 1): one MXU push gives per-channel
    #      group-mean and group-mean-of-squares for all samples at once ----
    stats1 = jnp.dot(jnp.concatenate([a, a * a], axis=0), g1_ref[...],
                     preferred_element_type=jnp.float32)                   # (2*NB, Cin)
    mean1 = stats1[:nb]
    var1 = stats1[nb:] - mean1 * mean1
    atten = jax.nn.sigmoid((a - mean1) * jax.lax.rsqrt(var1 + EPS))        # (NB, Cin)

    # ---- fold x + x*atten == x @ diag(1+atten) into the conv weight ----
    wcs = wc_ref[...][None, :, :] * (1.0 + atten)[:, :, None]              # (NB, Cin, Cout)

    # ---- 1x1 conv (no bias): batched (HW, Cin) @ (Cin, Cout) on MXU ----
    y = jnp.einsum('nhc,nco->nho', x, wcs,
                   preferred_element_type=jnp.float32)                     # (NB, HW, Cout)

    # ---- GroupNorm2 over (HW x group-channels) per sample ----
    sum_c = jnp.sum(y, axis=1)                                             # (NB, Cout)
    sq_c = jnp.sum(y * y, axis=1)                                          # (NB, Cout)
    stats2 = jnp.dot(jnp.concatenate([sum_c, sq_c], axis=0), g2_ref[...],
                     preferred_element_type=jnp.float32) * (1.0 / hw)      # (2*NB, Cout)
    mean2 = stats2[:nb]                                                    # (NB, Cout)
    var2 = stats2[nb:] - mean2 * mean2
    out = (y - mean2[:, None, :]) * jax.lax.rsqrt(var2 + EPS)[:, None, :]  # GN w=1, b=0

    out_ref[...] = out.astype(out_ref.dtype)


def _group_avg_matrix(num_channels, num_groups):
    """G[c, c'] = 1/cg if c, c' are in the same group else 0  (== g @ g.T / cg)."""
    cg = num_channels // num_groups
    gid = np.arange(num_channels) // cg
    return jnp.asarray((gid[:, None] == gid[None, :]).astype(np.float32) / cg)


def fsm_forward_channels_last(x_nlc, w_atten, w_conv):
    """Channels-last entry point. x_nlc: (N, H*W, Cin) f32. Returns (N, H*W, Cout)."""
    n, hw, cin = x_nlc.shape
    cout = w_conv.shape[0]

    # conv weights (out, in, 1, 1) -> (in, out) so the kernel does  act @ W
    wa = jnp.transpose(w_atten[:, :, 0, 0], (1, 0)).astype(jnp.float32)   # (Cin, Cin)
    wc = jnp.transpose(w_conv[:, :, 0, 0], (1, 0)).astype(jnp.float32)    # (Cin, Cout)

    g1 = _group_avg_matrix(cin, NUM_GROUPS)    # (Cin, Cin)
    g2 = _group_avg_matrix(cout, NUM_GROUPS)   # (Cout, Cout)

    # Samples per grid step: amortize per-step overhead but keep >= 2 grid steps
    # (when possible) so v7x's two TensorCores both get a "parallel" slice.
    nb = n // 2 if (n % 2 == 0 and n >= 2) else 1
    num_blocks = n // nb

    out = pl.pallas_call(
        _fsm_kernel,
        out_shape=jax.ShapeDtypeStruct((n, hw, cout), jnp.float32),
        grid_spec=pltpu.PrefetchScalarGridSpec(
            num_scalar_prefetch=0,
            grid=(num_blocks,),
            in_specs=[
                pl.BlockSpec((nb, hw, cin), lambda b: (b, 0, 0)),
                pl.BlockSpec((cin, cin), lambda b: (0, 0)),    # grid-invariant weights:
                pl.BlockSpec((cin, cout), lambda b: (0, 0)),   # same block every step,
                pl.BlockSpec((cin, cin), lambda b: (0, 0)),    # not re-DMA'd.
                pl.BlockSpec((cout, cout), lambda b: (0, 0)),
            ],
            out_specs=pl.BlockSpec((nb, hw, cout), lambda b: (b, 0, 0)),
        ),
        compiler_params=pltpu.CompilerParams(dimension_semantics=("parallel",)),
    )(x_nlc, wa, wc, g1, g2)
    return out


def fsm_forward(x_nchw, w_atten, w_conv):
    """NCHW wrapper matching the PyTorch module. Prefer fsm_forward_channels_last
    in a channels-last pipeline to avoid the two HBM transpose round-trips."""
    n, cin, h, w = x_nchw.shape
    cout = w_conv.shape[0]
    x_nlc = jnp.transpose(x_nchw, (0, 2, 3, 1)).reshape(n, h * w, cin)
    out = fsm_forward_channels_last(x_nlc, w_atten, w_conv)
    return jnp.transpose(out.reshape(n, h, w, cout), (0, 3, 1, 2))


def fsm_reference(x, w_atten, w_conv):
    """Pure-JAX reference mirroring the PyTorch forward (NCHW)."""
    def group_norm(y, num_groups):
        nn_, c, hh, ww = y.shape
        yg = y.reshape(nn_, num_groups, c // num_groups, hh, ww)
        mean = jnp.mean(yg, axis=(2, 3, 4), keepdims=True)
        var = jnp.mean((yg - mean) ** 2, axis=(2, 3, 4), keepdims=True)
        return ((yg - mean) / jnp.sqrt(var + EPS)).reshape(nn_, c, hh, ww)

    pooled = jnp.mean(x, axis=(2, 3), keepdims=True)                      # (N, Cin, 1, 1)
    a = jnp.einsum("oi,nihw->nohw", w_atten[:, :, 0, 0], pooled)
    atten = jax.nn.sigmoid(group_norm(a, NUM_GROUPS))
    x2 = x + x * atten
    y = jnp.einsum("oi,nihw->nohw", w_conv[:, :, 0, 0], x2)
    return group_norm(y, NUM_GROUPS)


if __name__ == "__main__":
    # GroupNorm(32, C) requires C % 32 == 0 -> use in_chan = out_chan = 64.
    N, CIN, COUT, H, W = 2, 64, 64, 16, 16

    key = jax.random.PRNGKey(0)
    kx, ka, kc = jax.random.split(key, 3)

    x = jax.random.normal(kx, (N, CIN, H, W), dtype=jnp.float32)
    # kaiming_normal_(mode='fan_out', nonlinearity='relu'): std = sqrt(2 / (out_ch * 1 * 1))
    w_atten = jax.random.normal(ka, (CIN, CIN, 1, 1), dtype=jnp.float32) * np.sqrt(2.0 / CIN)
    w_conv = jax.random.normal(kc, (COUT, CIN, 1, 1), dtype=jnp.float32) * np.sqrt(2.0 / COUT)

    out = jax.block_until_ready(fsm_forward(x, w_atten, w_conv))
    ref = jax.block_until_ready(fsm_reference(x, w_atten, w_conv))

    assert out.shape == (N, COUT, H, W)
    np.testing.assert_allclose(np.asarray(out), np.asarray(ref), rtol=2e-3, atol=2e-3)
    print("KERNEL_OK")
</pallas_src>

<mosaic_0001>
module attributes {stable_mosaic.version = 11 : i64} {
  func.func @_fsm_kernel(%arg0: i32, %arg1: memref<1x256x64xf32, #tpu.memory_space<vmem>>, %arg2: memref<64x64xf32, #tpu.memory_space<vmem>>, %arg3: memref<64x64xf32, #tpu.memory_space<vmem>>, %arg4: memref<64x64xf32, #tpu.memory_space<vmem>>, %arg5: memref<64x64xf32, #tpu.memory_space<vmem>>, %arg6: memref<1x256x64xf32, #tpu.memory_space<vmem>>) attributes {dimension_semantics = [#tpu.dimension_semantics<parallel>], iteration_bounds = array<i64: 2>, scalar_prefetch = 0 : i64, scratch_operands = 0 : i64, tpu.core_type = #tpu.core_type<tc>, window_params = [{transform_indices = @transform_0, window_bounds = array<i64: 1, 256, 64>}, {pipeline_mode = #tpu.pipeline_mode<synchronous>, transform_indices = @transform_1, window_bounds = array<i64: 64, 64>}, {pipeline_mode = #tpu.pipeline_mode<synchronous>, transform_indices = @transform_2, window_bounds = array<i64: 64, 64>}, {pipeline_mode = #tpu.pipeline_mode<synchronous>, transform_indices = @transform_3, window_bounds = array<i64: 64, 64>}, {pipeline_mode = #tpu.pipeline_mode<synchronous>, transform_indices = @transform_4, window_bounds = array<i64: 64, 64>}, {transform_indices = @transform_5, window_bounds = array<i64: 1, 256, 64>}]} {
    %c0 = arith.constant 0 : index
    %c0_0 = arith.constant 0 : index
    %c0_1 = arith.constant 0 : index
    %0 = vector.load %arg1[%c0, %c0_0, %c0_1] : memref<1x256x64xf32, #tpu.memory_space<vmem>>, vector<1x256x64xf32>
    %cst = arith.constant dense<0.000000e+00> : vector<1x64xf32>
    %1 = vector.multi_reduction <add>, %0, %cst [1] : vector<1x256x64xf32> to vector<1x64xf32>
    %cst_2 = arith.constant 3.906250e-03 : f32
    %2 = vector.broadcast %cst_2 : f32 to vector<1x64xf32>
    %3 = arith.mulf %1, %2 : vector<1x64xf32>
    %c0_3 = arith.constant 0 : index
    %c0_4 = arith.constant 0 : index
    %4 = vector.load %arg2[%c0_3, %c0_4] : memref<64x64xf32, #tpu.memory_space<vmem>>, vector<64x64xf32>
    %cst_5 = arith.constant dense<0.000000e+00> : vector<1x64xf32>
    %5 = tpu.matmul %3, %4, %cst_5 {dimension_numbers = #tpu.dot_dimension_numbers<[1], [0], [0], [1], [0, 0, 1, 1], [], []>} : vector<1x64xf32>, vector<64x64xf32>, vector<1x64xf32> -> vector<1x64xf32>
    %6 = arith.mulf %5, %5 : vector<1x64xf32>
    %7 = tpu.concatenate %5, %6 in 0 : vector<1x64xf32>, vector<1x64xf32> -> vector<2x64xf32>
    %c0_6 = arith.constant 0 : index
    %c0_7 = arith.constant 0 : index
    %8 = vector.load %arg4[%c0_6, %c0_7] : memref<64x64xf32, #tpu.memory_space<vmem>>, vector<64x64xf32>
    %cst_8 = arith.constant dense<0.000000e+00> : vector<2x64xf32>
    %9 = tpu.matmul %7, %8, %cst_8 {dimension_numbers = #tpu.dot_dimension_numbers<[1], [0], [0], [1], [0, 0, 1, 1], [], []>} : vector<2x64xf32>, vector<64x64xf32>, vector<2x64xf32> -> vector<2x64xf32>
    %10 = vector.extract_strided_slice %9 {offsets = [0, 0], sizes = [1, 64], strides = [1, 1]} : vector<2x64xf32> to vector<1x64xf32>
    %11 = vector.extract_strided_slice %9 {offsets = [1, 0], sizes = [1, 64], strides = [1, 1]} : vector<2x64xf32> to vector<1x64xf32>
    %12 = arith.mulf %10, %10 : vector<1x64xf32>
    %13 = arith.subf %11, %12 : vector<1x64xf32>
    %14 = arith.subf %5, %10 : vector<1x64xf32>
    %cst_9 = arith.constant 9.99999974E-6 : f32
    %15 = vector.broadcast %cst_9 : f32 to vector<1x64xf32>
    %16 = arith.addf %13, %15 : vector<1x64xf32>
    %17 = math.rsqrt %16 : vector<1x64xf32>
    %18 = arith.mulf %14, %17 : vector<1x64xf32>
    %19 = arith.negf %18 : vector<1x64xf32>
    %20 = math.exp %19 : vector<1x64xf32>
    %cst_10 = arith.constant 1.000000e+00 : f32
    %21 = vector.broadcast %cst_10 : f32 to vector<1x64xf32>
    %22 = arith.addf %21, %20 : vector<1x64xf32>
    %23 = arith.divf %21, %22 : vector<1x64xf32>
    %c0_11 = arith.constant 0 : index
    %c0_12 = arith.constant 0 : index
    %24 = vector.load %arg3[%c0_11, %c0_12] : memref<64x64xf32, #tpu.memory_space<vmem>>, vector<64x64xf32>
    %25 = vector.shape_cast %24 : vector<64x64xf32> to vector<1x64x64xf32>
    %cst_13 = arith.constant 1.000000e+00 : f32
    %26 = vector.broadcast %cst_13 : f32 to vector<1x64xf32>
    %27 = arith.addf %26, %23 : vector<1x64xf32>
    %28 = vector.shape_cast %27 : vector<1x64xf32> to vector<1x64x1xf32>
    %29 = vector.broadcast %28 : vector<1x64x1xf32> to vector<1x64x64xf32>
    %30 = arith.mulf %25, %29 : vector<1x64x64xf32>
    "tpu.trace_start"() <{level = 10 : i32, message = "nhc,nco->nho"}> : () -> ()
    %cst_14 = arith.constant dense<0.000000e+00> : vector<1x256x64xf32>
    %31 = tpu.matmul %0, %30, %cst_14 {dimension_numbers = #tpu.dot_dimension_numbers<[2], [1], [1], [2], [0, 0, 0, 1, 1, 2], [0], [0]>} : vector<1x256x64xf32>, vector<1x64x64xf32>, vector<1x256x64xf32> -> vector<1x256x64xf32>
    "tpu.trace_stop"() : () -> ()
    %cst_15 = arith.constant dense<0.000000e+00> : vector<1x64xf32>
    %32 = vector.multi_reduction <add>, %31, %cst_15 [1] : vector<1x256x64xf32> to vector<1x64xf32>
    %33 = arith.mulf %31, %31 : vector<1x256x64xf32>
    %cst_16 = arith.constant dense<0.000000e+00> : vector<1x64xf32>
    %34 = vector.multi_reduction <add>, %33, %cst_16 [1] : vector<1x256x64xf32> to vector<1x64xf32>
    %35 = tpu.concatenate %32, %34 in 0 : vector<1x64xf32>, vector<1x64xf32> -> vector<2x64xf32>
    %c0_17 = arith.constant 0 : index
    %c0_18 = arith.constant 0 : index
    %36 = vector.load %arg5[%c0_17, %c0_18] : memref<64x64xf32, #tpu.memory_space<vmem>>, vector<64x64xf32>
    %cst_19 = arith.constant dense<0.000000e+00> : vector<2x64xf32>
    %37 = tpu.matmul %35, %36, %cst_19 {dimension_numbers = #tpu.dot_dimension_numbers<[1], [0], [0], [1], [0, 0, 1, 1], [], []>} : vector<2x64xf32>, vector<64x64xf32>, vector<2x64xf32> -> vector<2x64xf32>
    %cst_20 = arith.constant 3.906250e-03 : f32
    %38 = vector.broadcast %cst_20 : f32 to vector<2x64xf32>
    %39 = arith.mulf %37, %38 : vector<2x64xf32>
    %40 = vector.extract_strided_slice %39 {offsets = [0, 0], sizes = [1, 64], strides = [1, 1]} : vector<2x64xf32> to vector<1x64xf32>
    %41 = vector.extract_strided_slice %39 {offsets = [1, 0], sizes = [1, 64], strides = [1, 1]} : vector<2x64xf32> to vector<1x64xf32>
    %42 = arith.mulf %40, %40 : vector<1x64xf32>
    %43 = arith.subf %41, %42 : vector<1x64xf32>
    %44 = vector.shape_cast %40 : vector<1x64xf32> to vector<1x1x64xf32>
    %45 = vector.broadcast %44 : vector<1x1x64xf32> to vector<1x256x64xf32>
    %46 = arith.subf %31, %45 : vector<1x256x64xf32>
    %cst_21 = arith.constant 9.99999974E-6 : f32
    %47 = vector.broadcast %cst_21 : f32 to vector<1x64xf32>
    %48 = arith.addf %43, %47 : vector<1x64xf32>
    %49 = math.rsqrt %48 : vector<1x64xf32>
    %50 = vector.shape_cast %49 : vector<1x64xf32> to vector<1x1x64xf32>
    %51 = vector.broadcast %50 : vector<1x1x64xf32> to vector<1x256x64xf32>
    %52 = arith.mulf %46, %51 : vector<1x256x64xf32>
    %c0_22 = arith.constant 0 : index
    %c0_23 = arith.constant 0 : index
    %c0_24 = arith.constant 0 : index
    %53 = vector.load %arg6[%c0_22, %c0_23, %c0_24] : memref<1x256x64xf32, #tpu.memory_space<vmem>>, vector<1x256x64xf32>
    tpu.vector_store %arg6[%c0_22, %c0_23, %c0_24], %52 {strides = array<i32>} : memref<1x256x64xf32, #tpu.memory_space<vmem>>, vector<1x256x64xf32>,
    return
  }
  func.func @transform_0(%arg0: i32) -> (i32, i32, i32) {
    %c0_i32 = arith.constant 0 : i32
    %c0_i32_0 = arith.constant 0 : i32
    %c0_i32_1 = arith.constant 0 : i32
    return %arg0, %c0_i32, %c0_i32_0 : i32, i32, i32
  }
  func.func @transform_1(%arg0: i32) -> (i32, i32) {
    %c0_i32 = arith.constant 0 : i32
    %c0_i32_0 = arith.constant 0 : i32
    %c0_i32_1 = arith.constant 0 : i32
    return %c0_i32, %c0_i32_0 : i32, i32
  }
  func.func @transform_2(%arg0: i32) -> (i32, i32) {
    %c0_i32 = arith.constant 0 : i32
    %c0_i32_0 = arith.constant 0 : i32
    %c0_i32_1 = arith.constant 0 : i32
    return %c0_i32, %c0_i32_0 : i32, i32
  }
  func.func @transform_3(%arg0: i32) -> (i32, i32) {
    %c0_i32 = arith.constant 0 : i32
    %c0_i32_0 = arith.constant 0 : i32
    %c0_i32_1 = arith.constant 0 : i32
    return %c0_i32, %c0_i32_0 : i32, i32
  }
  func.func @transform_4(%arg0: i32) -> (i32, i32) {
    %c0_i32 = arith.constant 0 : i32
    %c0_i32_0 = arith.constant 0 : i32
    %c0_i32_1 = arith.constant 0 : i32
    return %c0_i32, %c0_i32_0 : i32, i32
  }
  func.func @transform_5(%arg0: i32) -> (i32, i32, i32) {
    %c0_i32 = arith.constant 0 : i32
    %c0_i32_0 = arith.constant 0 : i32
    %c0_i32_1 = arith.constant 0 : i32
    return %arg0, %c0_i32, %c0_i32_0 : i32, i32, i32
  }
}

</mosaic_0001>

<bundles_post_ra>
// kernel: tpu_custom_call.1
= control target key start
LH: loop header
LB: loop body
LE: loop exit
PB: predicated region body
PF: predicated region fallthrough
CT: control target
= control target key end

     0   :  { %s1663_s18 = smov 0   ;;  %s2396_s0 = inlined_call_operand.vmem [shape: f32[2,256,64], index: 0, kind: input, shape index: {}]   ;;  %s2397_s1 = inlined_call_operand.vmem [shape: f32[64,64], index: 1, kind: input, shape index: {}]   ;;  %s2398_s2 = inlined_call_operand.vmem [shape: f32[64,64], index: 2, kind: input, shape index: {}]   ;;  %s2399_s3 = inlined_call_operand.vmem [shape: f32[64,64], index: 3, kind: input, shape index: {}]   ;;  %s2400_s4 = inlined_call_operand.vmem [shape: f32[64,64], index: 4, kind: input, shape index: {}]   ;;  %s2401_s5 = inlined_call_operand.vmem [shape: f32[2,256,64], index: 5, kind: output, shape index: {}]  }
   0x1 LB: > { %s1306_s19 = sadd.s32 4294967295, %s1628_s18   ;;  %p1310_p0 = scmp.ge.s32.totalorder %s1628_s18, 1  ;;  %s1628_s18 = sphi %s1663_s18, %s15_s18  }
   0x2   : > { %p187_p1 = scmp.lt.s32.totalorder %s1628_s18, 3 }
   0x4   : > { %p188_p2 = pnand %p1310_p0, %p187_p1 }
   0x5   : > { %v328_v0 = vld [vmem:[%s2397_s1] sm:$0xff] (!%p188_p2)  ;;  %v329_v1 = vld [vmem:[%s2397_s1 + $0x8] sm:$0xff] (!%p188_p2)  ;;  %v330_v2 = vld [vmem:[%s2397_s1 + $0x10] sm:$0xff] (!%p188_p2)  ;;  %v1630_v3 = vmov (!%p188_p2), 0.0|0.0   ;;  %vm1631_vm0 = vmmov (!%p188_p2), 0   ;;  %v1632_v6 = vmov (!%p188_p2), 0.0  }
   0x6   : > { %191 = sbr.rel (%p188_p2) target bundleno = 1266 (0x4f2), region = 40  ;;  %1543 = vmatprep.subr.bf16.mxu0 (!%p188_p2), %v1630_v3  ;;  %v1544_v4 = vpack.c.bf16 (!%p188_p2), %v329_v1, %v328_v0  ;;  %v331_v5 = vld [vmem:[%s2397_s1 + $0x18] sm:$0xff] (!%p188_p2)  ;;  %1438 = vmatprep.mubr.msk.f32.mxu0 (!%p188_p2), %vm1631_vm0, %v1632_v6  ;;  %p215_p3 = scmp.lt.s32.totalorder (!%p188_p2), %s1306_s19, 1  ;;  %v415_v7 = vld [vmem:[%s2399_s3] sm:$0xff] (!%p188_p2)  ;;  %v416_v9 = vld [vmem:[%s2399_s3 + $0x8] sm:$0xff] (!%p188_p2)  ;;  %vm257_vm1 = vcmask (!%p188_p2), 523264  }
   0x7   : > { %1555 = vmatprep.subr.bf16.mxu1 (!%p188_p2), %v1630_v3  ;;  %1457 = vmatprep.mubr.msk.f32.mxu1 (!%p188_p2), %vm1631_vm0, %v1632_v6  ;;  %v1547_v8 = vpack.c.bf16 (!%p188_p2), %v331_v5, %v330_v2  ;;  %v417_v10 = vld [vmem:[%s2399_s3 + $0x10] sm:$0xff] (!%p188_p2)  ;;  %v418_v11 = vld [vmem:[%s2399_s3 + $0x18] sm:$0xff] (!%p188_p2)  ;;  %v332_v12 = vld [vmem:[%s2397_s1 + $0x20] sm:$0xff] (!%p188_p2)  ;;  %v1556_v14 = vpack.c.bf16 (!%p188_p2), %v416_v9, %v415_v7  ;;  %vm413_vm2 = vcmask (!%p188_p2), 1040384  }
   0x8   : > { %1545 = vmatpush3.bf16.msra.mxu0 (!%p188_p2), %v1544_v4  ;;  %v333_v13 = vld [vmem:[%s2397_s1 + $0x28] sm:$0xff] (!%p188_p2)  ;;  %v1559_v15 = vpack.c.bf16 (!%p188_p2), %v418_v11, %v417_v10  ;;  %v419_v16 = vld [vmem:[%s2399_s3 + $0x20] sm:$0xff] (!%p188_p2)  ;;  %v334_v22 = vld [vmem:[%s2397_s1 + $0x30] sm:$0xff] (!%p188_p2) }
   0x9   : > { %1546 = vmatprep.subr.bf16.mxu0 (!%p188_p2), %v1630_v3  ;;  %1557 = vmatpush3.bf16.msra.mxu1 (!%p188_p2), %v1556_v14  ;;  %v420_v17 = vld [vmem:[%s2399_s3 + $0x28] sm:$0xff] (!%p188_p2)  ;;  %v1550_v18 = vpack.c.bf16 (!%p188_p2), %v333_v13, %v332_v12  ;;  %v335_v23 = vld [vmem:[%s2397_s1 + $0x38] sm:$0xff] (!%p188_p2) }
   0xa   : > { %1558 = vmatprep.subr.bf16.mxu1 (!%p188_p2), %v1630_v3  ;;  %v1562_v31 = vpack.c.bf16 (!%p188_p2), %v420_v17, %v419_v16  ;;  %v1553_v32 = vpack.c.bf16 (!%p188_p2), %v335_v23, %v334_v22 }
   0xc   : > { %1548 = vmatpush3.bf16.msra.mxu0 (!%p188_p2), %v1547_v8 }
   0xd   : > { %s2403_s19 = smov (!%p215_p3, %s1306_s19), 1  ;;  %1549 = vmatprep.subr.bf16.mxu0 %v1630_v3  ;;  %1560 = vmatpush3.bf16.msra.mxu1 %v1559_v15 }
   0xe   : > { %s1353_s15 = sshll.u32 %s2403_s19, 8  ;;  %1561 = vmatprep.subr.bf16.mxu1 %v1630_v3 }
   0xf   : > { %s1716_s20 = scalar_lea.vmem %s2396_s0, %s1353_s15  ;;  %s2327_s23 = scalar_lea.vmem %s2401_s5, %s1353_s15 }
  0x10   : > { %v1725_v19 = vld [vmem:[%s1716_s20] sm:$0xff]  ;;  %v1728_v20 = vld [vmem:[%s1716_s20 + $0x8] sm:$0xff]  ;;  %v1731_v21 = vld [vmem:[%s1716_s20 + $0x10] sm:$0xff]  ;;  %1551 = vmatpush3.bf16.msra.mxu0 %v1550_v18 }
  0x11   : > { %v1742_v24 = vld [vmem:[%s1716_s20 + $0x18] sm:$0xff]  ;;  %v258_v25 = vsel %vm257_vm1, %v1725_v19, 0.0  ;;  %v259_v26 = vsel %vm257_vm1, %v1728_v20, 0.0  ;;  %v261_v27 = vsel %vm257_vm1, %v1731_v21, 0.0  ;;  %v1751_v28 = vld [vmem:[%s1716_s20 + $0x20] sm:$0xff]  ;;  %v1756_v33 = vld [vmem:[%s1716_s20 + $0x28] sm:$0xff]  ;;  %1552 = vmatprep.subr.bf16.mxu0 %v1630_v3  ;;  %1563 = vmatpush3.bf16.msra.mxu1 %v1562_v31 }
  0x12   : > { %v260_v29 = vadd.f32 %v259_v26, %v258_v25  ;;  %v263_v30 = vsel %vm257_vm1, %v1742_v24, 0.0  ;;  %v265_v35 = vsel %vm257_vm1, %v1751_v28, 0.0  ;;  %v1763_v36 = vld [vmem:[%s1716_s20 + $0x30] sm:$0xff]  ;;  %v267_v38 = vsel %vm257_vm1, %v1756_v33, 0.0  ;;  %v1768_v39 = vld [vmem:[%s1716_s20 + $0x38] sm:$0xff]  ;;  %1564 = vmatprep.subr.bf16.mxu1 %v1630_v3  ;;  %v1774_v42 = vld [vmem:[%s1716_s20 + $0x40] sm:$0xff] }
  0x13   : > { %v269_v41 = vsel %vm257_vm1, %v1763_v36, 0.0  ;;  %v271_v44 = vsel %vm257_vm1, %v1768_v39, 0.0  ;;  %v1779_v45 = vld [vmem:[%s1716_s20 + $0x48] sm:$0xff]  ;;  %v273_v47 = vsel %vm257_vm1, %v1774_v42, 0.0  ;;  %v1784_v48 = vld [vmem:[%s1716_s20 + $0x50] sm:$0xff]  ;;  %v1789_v51 = vld [vmem:[%s1716_s20 + $0x58] sm:$0xff] }
  0x14   : > { %v262_v34 = vadd.f32 %v261_v27, %v260_v29  ;;  %1554 = vmatpush3.bf16.msra.mxu0 %v1553_v32  ;;  %v275_v50 = vsel %vm257_vm1, %v1779_v45, 0.0  ;;  %v277_v53 = vsel %vm257_vm1, %v1784_v48, 0.0  ;;  %v1794_v54 = vld [vmem:[%s1716_s20 + $0x60] sm:$0xff]  ;;  %v279_v56 = vsel %vm257_vm1, %v1789_v51, 0.0  ;;  %v1799_v57 = vld [vmem:[%s1716_s20 + $0x68] sm:$0xff]  ;;  %v1804_v60 = vld [vmem:[%s1716_s20 + $0x70] sm:$0xff] }
  0x15   : > { %v281_v59 = vsel %vm257_vm1, %v1794_v54, 0.0  ;;  %v283_v62 = vsel %vm257_vm1, %v1799_v57, 0.0  ;;  %v1809_v63 = vld [vmem:[%s1716_s20 + $0x78] sm:$0xff]  ;;  %v285_v1 = vsel %vm257_vm1, %v1804_v60, 0.0  ;;  %v1814_v2 = vld [vmem:[%s1716_s20 + $0x80] sm:$0xff]  ;;  %v1819_v7 = vld [vmem:[%s1716_s20 + $0x88] sm:$0xff] }
  0x16   : > { %v264_v37 = vadd.f32 %v263_v30, %v262_v34  ;;  %v287_v5 = vsel %vm257_vm1, %v1809_v63, 0.0  ;;  %v289_v9 = vsel %vm257_vm1, %v1814_v2, 0.0  ;;  %v1824_v10 = vld [vmem:[%s1716_s20 + $0x90] sm:$0xff]  ;;  %v291_v12 = vsel %vm257_vm1, %v1819_v7, 0.0  ;;  %v1829_v13 = vld [vmem:[%s1716_s20 + $0x98] sm:$0xff]  ;;  %v1834_v16 = vld [vmem:[%s1716_s20 + $0xa0] sm:$0xff] }
  0x17   : > { %v293_v15 = vsel %vm257_vm1, %v1824_v10, 0.0  ;;  %v295_v18 = vsel %vm257_vm1, %v1829_v13, 0.0  ;;  %v1839_v22 = vld [vmem:[%s1716_s20 + $0xa8] sm:$0xff]  ;;  %v297_v25 = vsel %vm257_vm1, %v1834_v16, 0.0  ;;  %v1844_v26 = vld [vmem:[%s1716_s20 + $0xb0] sm:$0xff]  ;;  %v1849_v30 = vld [vmem:[%s1716_s20 + $0xb8] sm:$0xff] }
  0x18   : > { %v266_v40 = vadd.f32 %v265_v35, %v264_v37  ;;  %v299_v29 = vsel %vm257_vm1, %v1839_v22, 0.0  ;;  %v301_v32 = vsel %vm257_vm1, %v1844_v26, 0.0  ;;  %v1854_v34 = vld [vmem:[%s1716_s20 + $0xc0] sm:$0xff]  ;;  %v303_v37 = vsel %vm257_vm1, %v1849_v30, 0.0 }
  0x1a   : > { %v268_v43 = vadd.f32 %v267_v38, %v266_v40  ;;  %v1859_v38 = vld [vmem:[%s1716_s20 + $0xc8] sm:$0xff] }
  0x1c   : > { %v270_v46 = vadd.f32 %v269_v41, %v268_v43  ;;  %v305_v41 = vsel %vm257_vm1, %v1854_v34, 0.0  ;;  %v1864_v43 = vld [vmem:[%s1716_s20 + $0xd0] sm:$0xff] }
  0x1e   : > { %v272_v49 = vadd.f32 %v271_v44, %v270_v46  ;;  %v307_v46 = vsel %vm257_vm1, %v1859_v38, 0.0 }
  0x20   : > { %v274_v52 = vadd.f32 %v273_v47, %v272_v49  ;;  %v1869_v47 = vld [vmem:[%s1716_s20 + $0xd8] sm:$0xff] }
  0x22   : > { %v276_v55 = vadd.f32 %v275_v50, %v274_v52  ;;  %v309_v50 = vsel %vm257_vm1, %v1864_v43, 0.0  ;;  %v1874_v52 = vld [vmem:[%s1716_s20 + $0xe0] sm:$0xff] }
  0x24   : > { %v278_v58 = vadd.f32 %v277_v53, %v276_v55  ;;  %v311_v55 = vsel %vm257_vm1, %v1869_v47, 0.0 }
  0x26   : > { %v280_v61 = vadd.f32 %v279_v56, %v278_v58  ;;  %v1879_v56 = vld [vmem:[%s1716_s20 + $0xe8] sm:$0xff] }
  0x28   : > { %v282_v0 = vadd.f32 %v281_v59, %v280_v61  ;;  %v313_v59 = vsel %vm257_vm1, %v1874_v52, 0.0  ;;  %v1884_v61 = vld [vmem:[%s1716_s20 + $0xf0] sm:$0xff] }
  0x2a   : > { %v284_v4 = vadd.f32 %v283_v62, %v282_v0  ;;  %v315_v0 = vsel %vm257_vm1, %v1879_v56, 0.0 }
  0x2c   : > { %v286_v8 = vadd.f32 %v285_v1, %v284_v4  ;;  %v1889_v1 = vld [vmem:[%s1716_s20 + $0xf8] sm:$0xff] }
  0x2e   : > { %v288_v11 = vadd.f32 %v287_v5, %v286_v8  ;;  %v317_v5 = vsel %vm257_vm1, %v1884_v61, 0.0 }
  0x30   : > { %v290_v14 = vadd.f32 %v289_v9, %v288_v11  ;;  %v319_v9 = vsel %vm257_vm1, %v1889_v1, 0.0 }
  0x32   : > { %v292_v17 = vadd.f32 %v291_v12, %v290_v14 }
  0x34   : > { %v294_v23 = vadd.f32 %v293_v15, %v292_v17 }
  0x36   : > { %v296_v27 = vadd.f32 %v295_v18, %v294_v23 }
  0x38   : > { %v298_v31 = vadd.f32 %v297_v25, %v296_v27 }
  0x3a   : > { %v300_v35 = vadd.f32 %v299_v29, %v298_v31  ;;  %v421_v29 = vld [vmem:[%s2399_s3 + $0x30] sm:$0xff]  ;;  %v422_v31 = vld [vmem:[%s2399_s3 + $0x38] sm:$0xff] }
  0x3c   : > { %v302_v40 = vadd.f32 %v301_v32, %v300_v35  ;;  %v1565_v32 = vpack.c.bf16 %v422_v31, %v421_v29  ;;  %v516_v29 = vld [vmem:[%s2398_s2 + $0x10] sm:$0xff] }
  0x3e   : > { %v304_v44 = vadd.f32 %v303_v37, %v302_v40  ;;  %1566 = vmatpush3.bf16.msra.mxu1 %v1565_v32 }
  0x40   : > { %v306_v49 = vadd.f32 %v305_v41, %v304_v44 }
  0x42   : > { %v308_v53 = vadd.f32 %v307_v46, %v306_v49 }
  0x44   : > { %v310_v58 = vadd.f32 %v309_v50, %v308_v53 }
  0x46   : > { %v312_v62 = vadd.f32 %v311_v55, %v310_v58 }
  0x48   : > { %v314_v4 = vadd.f32 %v313_v59, %v312_v62 }
  0x4a   : > { %v316_v8 = vadd.f32 %v315_v0, %v314_v4 }
  0x4c   : > { %v318_v11 = vadd.f32 %v317_v5, %v316_v8 }
  0x4e   : > { %v320_v12 = vadd.f32 %v319_v9, %v318_v11  ;;  %v523_v9 = vlaneseq }
  0x50   : > { %v321_v14 = vrot.slane %v320_v12, 4  ;;  %v1908_v11 = vshrl.u32 %v523_v9, 7 }
  0x52   : > { %v322_v15 = vadd.f32 %v321_v14, %v320_v12 }
  0x54   : > { %v323_v17 = vrot.slane %v322_v15, 2 }
  0x56   : > { %v324_v18 = vadd.f32 %v323_v17, %v322_v15 }
  0x58   : > { %v325_v23 = vrot.slane %v324_v18, 1 }
  0x5a   : > { %v326_v25 = vadd.f32 %v325_v23, %v324_v18  ;;  %v514_v23 = vld [vmem:[%s2398_s2] sm:$0xff] }
  0x5c   : > { %v327_v27 = vmul.f32 0.00390625, %v326_v25  ;;  %v517_v25 = vld [vmem:[%s2398_s2 + $0x18] sm:$0xff] }
  0x5e   : > { %1439 = vmatmul.mubr.msk.f32.vlgmr.msra.gmra.mrb[0].mxu0 %vm257_vm1, %v327_v27  ;;  %v515_v27 = vld [vmem:[%s2398_s2 + $0x8] sm:$0xff] }
  0x5f   : > { %1476 = vmatprep.mubr.msk.f32.mxu0 %vm257_vm1, %v1725_v19 }
 0x131   : > { %v405_v35 = vpop.f32.mrb[0].mxu0 }
 0x132   : > { %v409_v37 = vmul.f32 %v405_v35, %v405_v35  ;;  %v1440_v40 = vpop.f32.mrb[1].mxu0 }
 0x134   : > { %v411_v41 = vrot.slane %v409_v37, 7 }
 0x136   : > { %v414_v44 = vsel %vm413_vm2, %v405_v35, %v411_v41  ;;  %v519_v41 = vld [vmem:[%s2398_s2 + $0x28] sm:$0xff] }
 0x137   : > { %1458 = vmatmul.mubr.msk.f32.vlgmr.msra.gmra.mrb[0].mxu1 %vm257_vm1, %v414_v44  ;;  %v518_v44 = vld [vmem:[%s2398_s2 + $0x20] sm:$0xff] }
 0x138   : > { %1503 = vmatprep.mubr.msk.f32.mxu1 %vm257_vm1, %v1824_v10  ;;  %v525_v10 = vsub.s32 0, %v1908_v11 }
 0x20a   : > { %v492_v19 = vpop.f32.mrb[0].mxu1 }
 0x20b   : > { %v496_v46 = vmul.f32 %v492_v19, %v492_v19  ;;  %v501_v49 = vsub.f32 %v405_v35, %v492_v19  ;;  %v1459_v50 = vpop.f32.mrb[1].mxu1 }
 0x20d   : > { %v498_v53 = vrot.slane %v496_v46, 7 }
 0x20f   : > { %v500_v55 = vsub.f32 %v492_v19, %v498_v53 }
 0x211   : > { %v502_v58 = vadd.f32 1e-05, %v500_v55 }
 0x213   : > { %1614 = vrsqrt.f32 %v502_v58 }
 0x21d   : > { %v1615_v59 = vpop.eup %1614 }
 0x21e   : > { %v505_v62 = vrot.slane %v1615_v59, 1  ;;  %v521_v59 = vld [vmem:[%s2398_s2 + $0x38] sm:$0xff] }
 0x220   : > { %v507_v0 = vmul.f32 %v505_v62, %v501_v49  ;;  %v520_v62 = vld [vmem:[%s2398_s2 + $0x30] sm:$0xff] }
 0x222   : > { %v1317_v4 = vmul.f32 -1.442695, %v507_v0 }
 0x224   : > { %1616 = vpow2.f32 %v1317_v4 }
 0x22e   : > { %v1617_v5 = vpop.eup %1616 }
 0x22f   : > { %v511_v8 = vadd.f32 1.0, %v1617_v5 }
 0x231   : > { %1618 = vrcp.f32 %v511_v8 }
 0x23b   : > { %v1619_v12 = vpop.eup %1618 }
 0x23c   : > { %v522_v14 = vadd.f32 1.0, %v1619_v12 }
 0x23e   : > { %v526_v15 = vrot.slane %v522_v14, %v525_v10 }
 0x240   : > { %536 = vbcast.lane.b32.xlu1 %v526_v15, 272  ;;  %528 = vbcast.lane.b32.xlu0 %v526_v15, 256 }
 0x244   : > { %540 = vbcast.lane.b32.xlu1 %v526_v15, 280  ;;  %532 = vbcast.lane.b32.xlu0 %v526_v15, 264 }
 0x248   : > { %548 = vbcast.lane.b32.xlu1 %v526_v15, 296  ;;  %544 = vbcast.lane.b32.xlu0 %v526_v15, 288 }
 0x24c   : > { %556 = vbcast.lane.b32.xlu1 %v526_v15, 312  ;;  %552 = vbcast.lane.b32.xlu0 %v526_v15, 304 }
 0x2b2   : > { %v537_v17 = vpop.permute.xlu1 %536  ;;  %v529_v18 = vpop.permute.xlu0 %528 }
 0x2b3   : > { %v558_v35 = vmul.f32 %v529_v18, %v514_v23  ;;  %v560_v19 = vmul.f32 %v537_v17, %v516_v29 }
 0x2b6   : > { %v541_v31 = vpop.permute.xlu1 %540  ;;  %v533_v32 = vpop.permute.xlu0 %532 }
 0x2b7   : > { %v561_v37 = vmul.f32 %v541_v31, %v517_v25  ;;  %v559_v40 = vmul.f32 %v533_v32, %v515_v27 }
 0x2b9   : > { %v1567_v46 = vpack.c.bf16 %v559_v40, %v558_v35  ;;  %v1571_v53 = vpack.c.bf16 %v561_v37, %v560_v19 }
 0x2ba   : > { %v549_v49 = vpop.permute.xlu1 %548  ;;  %v545_v50 = vpop.permute.xlu0 %544 }
 0x2bb   : > { %v563_v55 = vmul.f32 %v549_v49, %v519_v41  ;;  %v562_v58 = vmul.f32 %v545_v50, %v518_v44  ;;  %1568 = vmatprep.subr.bf16.mxu0 %v1567_v46  ;;  %1595 = vmatprep.subr.bf16.mxu1 %v1567_v46 }
 0x2bc   : > { %1570 = vmatpush3.bf16.msra.mxu0 %v1567_v46  ;;  %1599 = vmatpush3.bf16.msra.mxu1 %v1567_v46 }
 0x2bd   : > { %1572 = vmatprep.subr.bf16.mxu0 %v1571_v53  ;;  %1596 = vmatprep.subr.bf16.mxu1 %v1571_v53  ;;  %v1575_v5 = vpack.c.bf16 %v563_v55, %v562_v58 }
 0x2be   : > { %v557_v0 = vpop.permute.xlu1 %556  ;;  %v553_v4 = vpop.permute.xlu0 %552 }
 0x2bf   : > { %v565_v8 = vmul.f32 %v557_v0, %v521_v59  ;;  %v564_v9 = vmul.f32 %v553_v4, %v520_v62 }
 0x2c0   : > { %1574 = vmatpush3.bf16.msra.mxu0 %v1571_v53  ;;  %1600 = vmatpush3.bf16.msra.mxu1 %v1571_v53 }
 0x2c1   : > { %1576 = vmatprep.subr.bf16.mxu0 %v1575_v5  ;;  %1597 = vmatprep.subr.bf16.mxu1 %v1575_v5  ;;  %v1579_v12 = vpack.c.bf16 %v565_v8, %v564_v9 }
 0x2c4   : > { %1578 = vmatpush3.bf16.msra.mxu0 %v1575_v5  ;;  %1601 = vmatpush3.bf16.msra.mxu1 %v1575_v5 }
 0x2c5   : > { %1580 = vmatprep.subr.bf16.mxu0 %v1579_v12  ;;  %1598 = vmatprep.subr.bf16.mxu1 %v1579_v12 }
 0x2c8   : > { %1582 = vmatpush3.bf16.msra.mxu0 %v1579_v12  ;;  %1602 = vmatpush3.bf16.msra.mxu1 %v1579_v12 }
 0x2c9   : > { %1583 = vmatprep.subr.bf16.mxu1 %v1630_v3 }
 0x2cb   : > { %1477 = vmatmul.mubr.msk.f32.vlgmr.msra.gmra.mrb[2].mxu0 %vm257_vm1, %v1728_v20  ;;  %1504 = vmatmul.mubr.msk.f32.vlgmr.msra.gmra.mrb[2].mxu1 %vm257_vm1, %v1829_v13  ;;  %v1058_v20 = vld [vmem:[%s2400_s4] sm:$0xff] }
 0x2cc   : > { %1479 = vmatprep.mubr.msk.f32.mxu0 %vm257_vm1, %v1731_v21  ;;  %1506 = vmatprep.mubr.msk.f32.mxu1 %vm257_vm1, %v1834_v16  ;;  %v1059_v21 = vld [vmem:[%s2400_s4 + $0x8] sm:$0xff] }
 0x2cf   : > { %1480 = vmatmul.mubr.msk.f32.gmra.mrb[4].mxu0 %vm257_vm1, %v1742_v24  ;;  %1507 = vmatmul.mubr.msk.f32.gmra.mrb[4].mxu1 %vm257_vm1, %v1839_v22  ;;  %v1584_v24 = vpack.c.bf16 %v1059_v21, %v1058_v20 }
 0x2d0   : > { %1482 = vmatprep.mubr.msk.f32.mxu0 %vm257_vm1, %v1751_v28  ;;  %1509 = vmatprep.mubr.msk.f32.mxu1 %vm257_vm1, %v1844_v26  ;;  %v1061_v28 = vld [vmem:[%s2400_s4 + $0x18] sm:$0xff] }
 0x2d1   : > { %1585 = vmatpush3.bf16.msra.mxu1 %v1584_v24 }
 0x2d2   : > { %1586 = vmatprep.subr.bf16.mxu1 %v1630_v3 }
 0x2d3   : > { %1483 = vmatmul.mubr.msk.f32.gmra.mrb[6].mxu0 %vm257_vm1, %v1756_v33  ;;  %1510 = vmatmul.mubr.msk.f32.gmra.mrb[6].mxu1 %vm257_vm1, %v1849_v30 }
 0x2d4   : > { %1485 = vmatprep.mubr.msk.f32.mxu0 %vm257_vm1, %v1763_v36  ;;  %1512 = vmatprep.mubr.msk.f32.mxu1 %vm257_vm1, %v1854_v34  ;;  %v1062_v36 = vld [vmem:[%s2400_s4 + $0x20] sm:$0xff] }
 0x2d7   : > { %1486 = vmatmul.mubr.msk.f32.gmra.mrb[8].mxu0 %vm257_vm1, %v1768_v39  ;;  %1513 = vmatmul.mubr.msk.f32.gmra.mrb[8].mxu1 %vm257_vm1, %v1859_v38  ;;  %v1063_v39 = vld [vmem:[%s2400_s4 + $0x28] sm:$0xff] }
 0x2d8   : > { %1488 = vmatprep.mubr.msk.f32.mxu0 %vm257_vm1, %v1774_v42  ;;  %1515 = vmatprep.mubr.msk.f32.mxu1 %vm257_vm1, %v1864_v43  ;;  %v1590_v42 = vpack.c.bf16 %v1063_v39, %v1062_v36 }
 0x2db   : > { %1489 = vmatmul.mubr.msk.f32.gmra.mrb[10].mxu0 %vm257_vm1, %v1779_v45  ;;  %1516 = vmatmul.mubr.msk.f32.gmra.mrb[10].mxu1 %vm257_vm1, %v1869_v47  ;;  %v1064_v45 = vld [vmem:[%s2400_s4 + $0x30] sm:$0xff] }
 0x2dc   : > { %1491 = vmatprep.mubr.msk.f32.mxu0 %vm257_vm1, %v1784_v48  ;;  %1518 = vmatprep.mubr.msk.f32.mxu1 %vm257_vm1, %v1874_v52  ;;  %v1065_v48 = vld [vmem:[%s2400_s4 + $0x38] sm:$0xff] }
 0x2df   : > { %1492 = vmatmul.mubr.msk.f32.gmra.mrb[12].mxu0 %vm257_vm1, %v1789_v51  ;;  %1519 = vmatmul.mubr.msk.f32.gmra.mrb[12].mxu1 %vm257_vm1, %v1879_v56  ;;  %v1593_v51 = vpack.c.bf16 %v1065_v48, %v1064_v45 }
 0x2e0   : > { %1494 = vmatprep.mubr.msk.f32.mxu0 %vm257_vm1, %v1794_v54  ;;  %1521 = vmatprep.mubr.msk.f32.mxu1 %vm257_vm1, %v1884_v61 }
 0x2e3   : > { %1495 = vmatmul.mubr.msk.f32.gmra.mrb[14].mxu0 %vm257_vm1, %v1799_v57  ;;  %1522 = vmatmul.mubr.msk.f32.gmra.mrb[14].mxu1 %vm257_vm1, %v1889_v1 }
 0x2e4   : > { %1497 = vmatprep.mubr.msk.f32.mxu0 %vm257_vm1, %v1804_v60  ;;  %1540 = vmatprep.mubr.msk.f32.mxu1 %vm1631_vm0, %v1632_v6  ;;  %v1060_v6 = vld [vmem:[%s2400_s4 + $0x10] sm:$0xff] }
 0x2e5   : > { %v1587_v33 = vpack.c.bf16 %v1061_v28, %v1060_v6 }
 0x2e7   : > { %1498 = vmatmul.mubr.msk.f32.gmra.mrb[16].mxu0 %vm257_vm1, %v1809_v63  ;;  %1588 = vmatpush3.bf16.msra.mxu1 %v1587_v33 }
 0x2e8   : > { %1500 = vmatprep.mubr.msk.f32.mxu0 %vm257_vm1, %v1814_v2  ;;  %1589 = vmatprep.subr.bf16.mxu1 %v1630_v3 }
 0x2eb   : > { %1501 = vmatmul.mubr.msk.f32.gmra.mrb[18].mxu0 %vm257_vm1, %v1819_v7  ;;  %1591 = vmatpush3.bf16.msra.mxu1 %v1590_v42 }
 0x2ec   : > { %1592 = vmatprep.subr.bf16.mxu1 %v1630_v3 }
 0x2ef   : > { %1594 = vmatpush3.bf16.msra.mxu1 %v1593_v51 }
 0x39e   : > { %v2027_v54 = vpop.f32.mrb[2].mxu0  ;;  %v2029_v57 = vpop.f32.mrb[2].mxu1 }
 0x39f   : > { %v888_v60 = vsel %vm257_vm1, %v2027_v54, 0.0  ;;  %v957_v3 = vmul.f32 %v2027_v54, %v2027_v54  ;;  %v2035_v63 = vpop.f32.mrb[3].mxu0  ;;  %v2037_v2 = vpop.f32.mrb[3].mxu1 }
 0x3a0   : > { %v887_v7 = vsel %vm257_vm1, %v2035_v63, 0.0  ;;  %v956_v13 = vmul.f32 %v2035_v63, %v2035_v63 }
 0x3a1   : > { %v989_v16 = vsel %vm257_vm1, %v957_v3, 0.0  ;;  %v889_v22 = vadd.f32 %v888_v60, %v887_v7 }
 0x3a2   : > { %v988_v26 = vsel %vm257_vm1, %v956_v13, 0.0  ;;  %v2045_v30 = vpop.f32.mrb[4].mxu0  ;;  %v2047_v34 = vpop.f32.mrb[4].mxu1 }
 0x3a3   : > { %v990_v38 = vadd.f32 %v989_v16, %v988_v26  ;;  %v2049_v43 = vpop.f32.mrb[5].mxu0  ;;  %v2051_v47 = vpop.f32.mrb[5].mxu1  ;;  %v959_v52 = vmul.f32 %v2045_v30, %v2045_v30  ;;  %v892_v14 = vsel %vm257_vm1, %v2045_v30, 0.0 }
 0x3a4   : > { %v890_v56 = vsel %vm257_vm1, %v2049_v43, 0.0  ;;  %v958_v61 = vmul.f32 %v2049_v43, %v2049_v43 }
 0x3a5   : > { %v891_v1 = vadd.f32 %v890_v56, %v889_v22  ;;  %v993_v31 = vsel %vm257_vm1, %v959_v52, 0.0 }
 0x3a6   : > { %v991_v15 = vsel %vm257_vm1, %v958_v61, 0.0  ;;  %v2062_v17 = vpop.f32.mrb[6].mxu0  ;;  %v2064_v18 = vpop.f32.mrb[6].mxu1 }
 0x3a7   : > { %v992_v23 = vadd.f32 %v991_v15, %v990_v38  ;;  %v2066_v25 = vpop.f32.mrb[7].mxu0  ;;  %v893_v27 = vadd.f32 %v892_v14, %v891_v1  ;;  %v2068_v29 = vpop.f32.mrb[7].mxu1  ;;  %v961_v32 = vmul.f32 %v2062_v17, %v2062_v17  ;;  %v896_v44 = vsel %vm257_vm1, %v2062_v17, 0.0 }
 0x3a8   : > { %v894_v35 = vsel %vm257_vm1, %v2066_v25, 0.0  ;;  %v960_v37 = vmul.f32 %v2066_v25, %v2066_v25 }
 0x3a9   : > { %v895_v40 = vadd.f32 %v894_v35, %v893_v27  ;;  %v994_v41 = vadd.f32 %v993_v31, %v992_v23  ;;  %v997_v59 = vsel %vm257_vm1, %v961_v32, 0.0 }
 0x3aa   : > { %v995_v19 = vsel %vm257_vm1, %v960_v37, 0.0  ;;  %v2080_v46 = vpop.f32.mrb[8].mxu0  ;;  %v2082_v49 = vpop.f32.mrb[8].mxu1 }
 0x3ab   : > { %v996_v50 = vadd.f32 %v995_v19, %v994_v41  ;;  %v2084_v53 = vpop.f32.mrb[9].mxu0  ;;  %v897_v55 = vadd.f32 %v896_v44, %v895_v40  ;;  %v2086_v58 = vpop.f32.mrb[9].mxu1  ;;  %v963_v62 = vmul.f32 %v2080_v46, %v2080_v46  ;;  %v900_v9 = vsel %vm257_vm1, %v2080_v46, 0.0 }
 0x3ac   : > { %v898_v0 = vsel %vm257_vm1, %v2084_v53, 0.0  ;;  %v962_v4 = vmul.f32 %v2084_v53, %v2084_v53 }
 0x3ad   : > { %v899_v5 = vadd.f32 %v898_v0, %v897_v55  ;;  %v998_v8 = vadd.f32 %v997_v59, %v996_v50  ;;  %v1001_v36 = vsel %vm257_vm1, %v963_v62, 0.0 }
 0x3ae   : > { %v999_v12 = vsel %vm257_vm1, %v962_v4, 0.0  ;;  %v2098_v20 = vpop.f32.mrb[10].mxu0  ;;  %v2100_v21 = vpop.f32.mrb[10].mxu1 }
 0x3af   : > { %v1000_v24 = vadd.f32 %v999_v12, %v998_v8  ;;  %v2102_v6 = vpop.f32.mrb[11].mxu0  ;;  %v901_v28 = vadd.f32 %v900_v9, %v899_v5  ;;  %v2104_v33 = vpop.f32.mrb[11].mxu1  ;;  %v965_v39 = vmul.f32 %v2098_v20, %v2098_v20  ;;  %v904_v60 = vsel %vm257_vm1, %v2098_v20, 0.0 }
 0x3b0   : > { %v902_v42 = vsel %vm257_vm1, %v2102_v6, 0.0  ;;  %v964_v45 = vmul.f32 %v2102_v6, %v2102_v6 }
 0x3b1   : > { %v903_v48 = vadd.f32 %v902_v42, %v901_v28  ;;  %v1002_v51 = vadd.f32 %v1001_v36, %v1000_v24  ;;  %v1005_v52 = vsel %vm257_vm1, %v965_v39, 0.0 }
 0x3b2   : > { %v1003_v3 = vsel %vm257_vm1, %v964_v45, 0.0  ;;  %v2116_v7 = vpop.f32.mrb[12].mxu0  ;;  %v2118_v13 = vpop.f32.mrb[12].mxu1 }
 0x3b3   : > { %v1004_v16 = vadd.f32 %v1003_v3, %v1002_v51  ;;  %v2120_v22 = vpop.f32.mrb[13].mxu0  ;;  %v905_v26 = vadd.f32 %v904_v60, %v903_v48  ;;  %v2122_v38 = vpop.f32.mrb[13].mxu1  ;;  %v967_v56 = vmul.f32 %v2116_v7, %v2116_v7  ;;  %v908_v23 = vsel %vm257_vm1, %v2116_v7, 0.0 }
 0x3b4   : > { %v906_v61 = vsel %vm257_vm1, %v2120_v22, 0.0  ;;  %v966_v1 = vmul.f32 %v2120_v22, %v2120_v22 }
 0x3b5   : > { %v907_v14 = vadd.f32 %v906_v61, %v905_v26  ;;  %v1006_v15 = vadd.f32 %v1005_v52, %v1004_v16  ;;  %v1009_v44 = vsel %vm257_vm1, %v967_v56, 0.0  ;;  %v974_v52 = vmul.f32 %v2037_v2, %v2037_v2 }
 0x3b6   : > { %v1007_v27 = vsel %vm257_vm1, %v966_v1, 0.0  ;;  %v2134_v31 = vpop.f32.mrb[14].mxu0  ;;  %v2136_v32 = vpop.f32.mrb[14].mxu1 }
 0x3b7   : > { %v1008_v35 = vadd.f32 %v1007_v27, %v1006_v15  ;;  %v2138_v37 = vpop.f32.mrb[15].mxu0  ;;  %v909_v40 = vadd.f32 %v908_v23, %v907_v14  ;;  %v2140_v41 = vpop.f32.mrb[15].mxu1  ;;  %v969_v19 = vmul.f32 %v2134_v31, %v2134_v31  ;;  %v912_v0 = vsel %vm257_vm1, %v2134_v31, 0.0 }
 0x3b8   : > { %v910_v50 = vsel %vm257_vm1, %v2138_v37, 0.0  ;;  %v968_v55 = vmul.f32 %v2138_v37, %v2138_v37 }
 0x3b9   : > { %v911_v59 = vadd.f32 %v910_v50, %v909_v40  ;;  %v1010_v62 = vadd.f32 %v1009_v44, %v1008_v35  ;;  %v1013_v24 = vsel %vm257_vm1, %v969_v19, 0.0  ;;  %v922_v40 = vsel %vm257_vm1, %v2037_v2, 0.0 }
 0x3ba   : > { %v1011_v4 = vsel %vm257_vm1, %v968_v55, 0.0  ;;  %v2152_v5 = vpop.f32.mrb[16].mxu0  ;;  %v975_v55 = vmul.f32 %v2029_v57, %v2029_v57 }
 0x3bb   : > { %v1012_v8 = vadd.f32 %v1011_v4, %v1010_v62  ;;  %v2154_v9 = vpop.f32.mrb[17].mxu0  ;;  %v913_v12 = vadd.f32 %v912_v0, %v911_v59  ;;  %v971_v28 = vmul.f32 %v2152_v5, %v2152_v5  ;;  %v916_v48 = vsel %vm257_vm1, %v2152_v5, 0.0 }
 0x3bc   : > { %v914_v36 = vsel %vm257_vm1, %v2154_v9, 0.0  ;;  %v970_v39 = vmul.f32 %v2154_v9, %v2154_v9  ;;  %v1023_v59 = vsel %vm257_vm1, %v974_v52, 0.0  ;;  %v976_v62 = vmul.f32 %v2051_v47, %v2051_v47 }
 0x3bd   : > { %v915_v42 = vadd.f32 %v914_v36, %v913_v12  ;;  %v1014_v45 = vadd.f32 %v1013_v24, %v1012_v8  ;;  %v1017_v56 = vsel %vm257_vm1, %v971_v28, 0.0  ;;  %v924_v8 = vsel %vm257_vm1, %v2029_v57, 0.0 }
 0x3be   : > { %v1015_v51 = vsel %vm257_vm1, %v970_v39, 0.0  ;;  %v2166_v60 = vpop.f32.mrb[18].mxu0  ;;  %v926_v12 = vsel %vm257_vm1, %v2051_v47, 0.0  ;;  %v1025_v36 = vsel %vm257_vm1, %v975_v55, 0.0  ;;  %v977_v39 = vmul.f32 %v2047_v34, %v2047_v34 }
 0x3bf   : > { %v1016_v3 = vadd.f32 %v1015_v51, %v1014_v45  ;;  %v2168_v16 = vpop.f32.mrb[19].mxu0  ;;  %v917_v26 = vadd.f32 %v916_v48, %v915_v42  ;;  %v973_v61 = vmul.f32 %v2166_v60, %v2166_v60  ;;  %v920_v27 = vsel %vm257_vm1, %v2166_v60, 0.0 }
 0x3c0   : > { %v918_v1 = vsel %vm257_vm1, %v2168_v16, 0.0  ;;  %v972_v14 = vmul.f32 %v2168_v16, %v2168_v16  ;;  %v1027_v42 = vsel %vm257_vm1, %v976_v62, 0.0  ;;  %v978_v45 = vmul.f32 %v2068_v29, %v2068_v29 }
 0x3c1   : > { %v919_v15 = vadd.f32 %v918_v1, %v917_v26  ;;  %v1018_v23 = vadd.f32 %v1017_v56, %v1016_v3  ;;  %v1021_v50 = vsel %vm257_vm1, %v973_v61, 0.0  ;;  %v928_v3 = vsel %vm257_vm1, %v2047_v34, 0.0 }
 0x3c2   : > { %v1019_v35 = vsel %vm257_vm1, %v972_v14, 0.0  ;;  %v930_v26 = vsel %vm257_vm1, %v2068_v29, 0.0  ;;  %v1029_v61 = vsel %vm257_vm1, %v977_v39, 0.0  ;;  %v979_v1 = vmul.f32 %v2064_v18, %v2064_v18 }
 0x3c3   : > { %v921_v44 = vadd.f32 %v920_v27, %v919_v15  ;;  %v1020_v19 = vadd.f32 %v1019_v35, %v1018_v23  ;;  %v1031_v14 = vsel %vm257_vm1, %v978_v45, 0.0  ;;  %v980_v15 = vmul.f32 %v2086_v58, %v2086_v58 }
 0x3c4   : > { %v932_v35 = vsel %vm257_vm1, %v2064_v18, 0.0  ;;  %v981_v55 = vmul.f32 %v2082_v49, %v2082_v49  ;;  %v982_v62 = vmul.f32 %v2104_v33, %v2104_v33  ;;  %v983_v39 = vmul.f32 %v2100_v21, %v2100_v21 }
 0x3c5   : > { %v1022_v0 = vadd.f32 %v1021_v50, %v1020_v19  ;;  %v923_v4 = vadd.f32 %v922_v40, %v921_v44  ;;  %v934_v40 = vsel %vm257_vm1, %v2086_v58, 0.0  ;;  %v1033_v50 = vsel %vm257_vm1, %v979_v1, 0.0 }
 0x3c6   : > { %v984_v45 = vmul.f32 %v2122_v38, %v2122_v38  ;;  %v985_v1 = vmul.f32 %v2118_v13, %v2118_v13 }
 0x3c7   : > { %v1024_v24 = vadd.f32 %v1023_v59, %v1022_v0  ;;  %v925_v28 = vadd.f32 %v924_v8, %v923_v4  ;;  %v1035_v59 = vsel %vm257_vm1, %v980_v15, 0.0  ;;  %v936_v8 = vsel %vm257_vm1, %v2082_v49, 0.0 }
 0x3c8   : > { %v986_v15 = vmul.f32 %v2140_v41, %v2140_v41 }
 0x3c9   : > { %v927_v48 = vadd.f32 %v926_v12, %v925_v28  ;;  %v1026_v51 = vadd.f32 %v1025_v36, %v1024_v24  ;;  %v938_v12 = vsel %vm257_vm1, %v2104_v33, 0.0  ;;  %v1037_v36 = vsel %vm257_vm1, %v981_v55, 0.0 }
 0x3ca   : > { %v987_v55 = vmul.f32 %v2136_v32, %v2136_v32 }
 0x3cb   : > { %v1028_v52 = vadd.f32 %v1027_v42, %v1026_v51  ;;  %v929_v56 = vadd.f32 %v928_v3, %v927_v48  ;;  %v1039_v42 = vsel %vm257_vm1, %v982_v62, 0.0  ;;  %v940_v3 = vsel %vm257_vm1, %v2100_v21, 0.0 }
 0x3cd   : > { %v931_v23 = vadd.f32 %v930_v26, %v929_v56  ;;  %v1030_v27 = vadd.f32 %v1029_v61, %v1028_v52  ;;  %v942_v26 = vsel %vm257_vm1, %v2122_v38, 0.0  ;;  %v1041_v61 = vsel %vm257_vm1, %v983_v39, 0.0 }
 0x3cf   : > { %v1032_v44 = vadd.f32 %v1031_v14, %v1030_v27  ;;  %v933_v19 = vadd.f32 %v932_v35, %v931_v23  ;;  %v1043_v14 = vsel %vm257_vm1, %v984_v45, 0.0  ;;  %v944_v35 = vsel %vm257_vm1, %v2118_v13, 0.0 }
 0x3d1   : > { %v935_v0 = vadd.f32 %v934_v40, %v933_v19  ;;  %v1034_v4 = vadd.f32 %v1033_v50, %v1032_v44  ;;  %v946_v40 = vsel %vm257_vm1, %v2140_v41, 0.0  ;;  %v1045_v50 = vsel %vm257_vm1, %v985_v1, 0.0 }
 0x3d3   : > { %v1036_v24 = vadd.f32 %v1035_v59, %v1034_v4  ;;  %v937_v28 = vadd.f32 %v936_v8, %v935_v0  ;;  %v1047_v59 = vsel %vm257_vm1, %v986_v15, 0.0  ;;  %v948_v4 = vsel %vm257_vm1, %v2136_v32, 0.0 }
 0x3d5   : > { %v939_v48 = vadd.f32 %v938_v12, %v937_v28  ;;  %v1038_v51 = vadd.f32 %v1037_v36, %v1036_v24  ;;  %v1049_v24 = vsel %vm257_vm1, %v987_v55, 0.0 }
 0x3d7   : > { %v1040_v52 = vadd.f32 %v1039_v42, %v1038_v51  ;;  %v941_v56 = vadd.f32 %v940_v3, %v939_v48 }
 0x3d9   : > { %v943_v23 = vadd.f32 %v942_v26, %v941_v56  ;;  %v1042_v27 = vadd.f32 %v1041_v61, %v1040_v52 }
 0x3db   : > { %v1044_v44 = vadd.f32 %v1043_v14, %v1042_v27  ;;  %v945_v19 = vadd.f32 %v944_v35, %v943_v23 }
 0x3dd   : > { %v947_v62 = vadd.f32 %v946_v40, %v945_v19  ;;  %v1046_v0 = vadd.f32 %v1045_v50, %v1044_v44 }
 0x3df   : > { %v949_v8 = vadd.f32 %v948_v4, %v947_v62  ;;  %v1048_v12 = vadd.f32 %v1047_v59, %v1046_v0 }
 0x3e1   : > { %v950_v28 = vrot.slane %v949_v8, 4  ;;  %v1050_v36 = vadd.f32 %v1049_v24, %v1048_v12 }
 0x3e3   : > { %v951_v39 = vadd.f32 %v950_v28, %v949_v8  ;;  %v1051_v42 = vrot.slane %v1050_v36, 4 }
 0x3e5   : > { %v952_v45 = vrot.slane %v951_v39, 2  ;;  %v1052_v48 = vadd.f32 %v1051_v42, %v1050_v36 }
 0x3e7   : > { %v953_v51 = vadd.f32 %v952_v45, %v951_v39  ;;  %v1053_v3 = vrot.slane %v1052_v48, 2 }
 0x3e9   : > { %v954_v26 = vrot.slane %v953_v51, 1  ;;  %v1054_v52 = vadd.f32 %v1053_v3, %v1052_v48 }
 0x3eb   : > { %v1055_v56 = vrot.slane %v1054_v52, 1  ;;  %v955_v61 = vadd.f32 %v954_v26, %v953_v51 }
 0x3ed   : > { %v1056_v1 = vadd.f32 %v1055_v56, %v1054_v52 }
 0x3ef   : > { %v1057_v14 = vsel %vm413_vm2, %v955_v61, %v1056_v1 }
 0x3f0   : > { %1541 = vmatmul.mubr.msk.f32.vlgmr.msra.gmra.mrb[16].mxu1 %vm257_vm1, %v1057_v14 }
 0x4c3   : > { %v1135_v15 = vpop.f32.mrb[16].mxu1 }
 0x4c4   : > { %v1139_v23 = vmul.f32 0.00390625, %v1135_v15  ;;  %v1542_v27 = vpop.f32.mrb[17].mxu1 }
 0x4c6   : > { %v1140_v35 = vmul.f32 %v1139_v23, %v1139_v23  ;;  %v2255_v40 = vrot.slane %v1139_v23, %v525_v10 }
 0x4c8   : > { %v1142_v44 = vrot.slane %v1140_v35, 7  ;;  %v1149_v19 = vsub.f32 %v2035_v63, %v2255_v40  ;;  %v1150_v50 = vsub.f32 %v2027_v54, %v2255_v40  ;;  %v1151_v55 = vsub.f32 %v2049_v43, %v2255_v40 }
 0x4c9   : > { %v1152_v59 = vsub.f32 %v2045_v30, %v2255_v40  ;;  %v1153_v62 = vsub.f32 %v2066_v25, %v2255_v40  ;;  %v1154_v10 = vsub.f32 %v2062_v17, %v2255_v40  ;;  %v1155_v0 = vsub.f32 %v2084_v53, %v2255_v40 }
 0x4ca   : > { %v1144_v4 = vsub.f32 %v1139_v23, %v1142_v44  ;;  %v1156_v63 = vsub.f32 %v2080_v46, %v2255_v40  ;;  %v1157_v54 = vsub.f32 %v2102_v6, %v2255_v40  ;;  %v1158_v43 = vsub.f32 %v2098_v20, %v2255_v40 }
 0x4cb   : > { %v1159_v30 = vsub.f32 %v2120_v22, %v2255_v40  ;;  %v1160_v25 = vsub.f32 %v2116_v7, %v2255_v40  ;;  %v1161_v17 = vsub.f32 %v2138_v37, %v2255_v40  ;;  %v1162_v53 = vsub.f32 %v2134_v31, %v2255_v40 }
 0x4cc   : > { %v1163_v46 = vsub.f32 %v2154_v9, %v2255_v40  ;;  %v1164_v6 = vsub.f32 %v2152_v5, %v2255_v40  ;;  %v1165_v20 = vsub.f32 %v2168_v16, %v2255_v40  ;;  %v1166_v22 = vsub.f32 %v2166_v60, %v2255_v40 }
 0x4cd   : > { %v1167_v7 = vsub.f32 %v2037_v2, %v2255_v40  ;;  %v1168_v37 = vsub.f32 %v2029_v57, %v2255_v40  ;;  %v1169_v31 = vsub.f32 %v2051_v47, %v2255_v40  ;;  %v1170_v9 = vsub.f32 %v2047_v34, %v2255_v40 }
 0x4ce   : > { %v1171_v5 = vsub.f32 %v2068_v29, %v2255_v40  ;;  %v1172_v16 = vsub.f32 %v2064_v18, %v2255_v40  ;;  %v1173_v60 = vsub.f32 %v2086_v58, %v2255_v40  ;;  %v1174_v2 = vsub.f32 %v2082_v49, %v2255_v40 }
 0x4cf   : > { %v1175_v57 = vsub.f32 %v2104_v33, %v2255_v40  ;;  %v1176_v47 = vsub.f32 %v2100_v21, %v2255_v40  ;;  %v1177_v34 = vsub.f32 %v2122_v38, %v2255_v40  ;;  %v1178_v29 = vsub.f32 %v2118_v13, %v2255_v40 }
 0x4d0   : > { %v1179_v18 = vsub.f32 %v2140_v41, %v2255_v40  ;;  %v1180_v58 = vsub.f32 %v2136_v32, %v2255_v40  ;;  %v1181_v8 = vadd.f32 1e-05, %v1144_v4  ;;  %v1185_v49 = vsub.s32 1, %v1908_v11 }
 0x4d2   : > { %1620 = vrsqrt.f32 %v1181_v8 }
 0x4dc   : > { %v1621_v33 = vpop.eup %1620 }
 0x4dd   : > { %v1186_v12 = vrot.slane %v1621_v33, %v1185_v49 }
 0x4df   : > { %v1187_v21 = vmul.f32 %v1186_v12, %v1149_v19  ;;  %v1188_v13 = vmul.f32 %v1186_v12, %v1150_v50  ;;  %v1189_v38 = vmul.f32 %v1186_v12, %v1151_v55  ;;  %v1190_v32 = vmul.f32 %v1186_v12, %v1152_v59 }
 0x4e0   : > { %v1191_v41 = vmul.f32 %v1186_v12, %v1153_v62  ;;  %v1192_v24 = vmul.f32 %v1186_v12, %v1154_v10  ;;  %v1193_v11 = vmul.f32 %v1186_v12, %v1155_v0  ;;  %v1194_v28 = vmul.f32 %v1186_v12, %v1156_v63 }
 0x4e1   : > { %v1195_v36 = vmul.f32 %v1186_v12, %v1157_v54  ;;  %v1196_v39 = vmul.f32 %v1186_v12, %v1158_v43  ;;  %v1197_v42 = vmul.f32 %v1186_v12, %v1159_v30  ;;  %v1198_v45 = vmul.f32 %v1186_v12, %v1160_v25  ;;  %1219 = vst.msk [vmem:[%s2327_s23] sm:$0xff] %vm257_vm1, %v1187_v21 }
 0x4e2   : > { %1220 = vst.msk [vmem:[%s2327_s23 + $0x8] sm:$0xff] %vm257_vm1, %v1188_v13  ;;  %1221 = vst.msk [vmem:[%s2327_s23 + $0x10] sm:$0xff] %vm257_vm1, %v1189_v38  ;;  %v1199_v48 = vmul.f32 %v1186_v12, %v1161_v17  ;;  %v1200_v51 = vmul.f32 %v1186_v12, %v1162_v53  ;;  %v1201_v3 = vmul.f32 %v1186_v12, %v1163_v46 }
 0x4e3   : > { %1222 = vst.msk [vmem:[%s2327_s23 + $0x18] sm:$0xff] %vm257_vm1, %v1190_v32  ;;  %v1202_v26 = vmul.f32 %v1186_v12, %v1164_v6  ;;  %1223 = vst.msk [vmem:[%s2327_s23 + $0x20] sm:$0xff] %vm257_vm1, %v1191_v41  ;;  %v1203_v52 = vmul.f32 %v1186_v12, %v1165_v20  ;;  %v1204_v56 = vmul.f32 %v1186_v12, %v1166_v22 }
 0x4e4   : > { %1224 = vst.msk [vmem:[%s2327_s23 + $0x28] sm:$0xff] %vm257_vm1, %v1192_v24  ;;  %1225 = vst.msk [vmem:[%s2327_s23 + $0x30] sm:$0xff] %vm257_vm1, %v1193_v11  ;;  %v1205_v61 = vmul.f32 %v1186_v12, %v1167_v7  ;;  %v1206_v1 = vmul.f32 %v1186_v12, %v1168_v37  ;;  %v1207_v14 = vmul.f32 %v1186_v12, %v1169_v31 }
 0x4e5   : > { %1226 = vst.msk [vmem:[%s2327_s23 + $0x38] sm:$0xff] %vm257_vm1, %v1194_v28  ;;  %1227 = vst.msk [vmem:[%s2327_s23 + $0x40] sm:$0xff] %vm257_vm1, %v1195_v36  ;;  %v1208_v15 = vmul.f32 %v1186_v12, %v1170_v9  ;;  %v1209_v23 = vmul.f32 %v1186_v12, %v1171_v5  ;;  %v1210_v27 = vmul.f32 %v1186_v12, %v1172_v16 }
 0x4e6   : > { %1228 = vst.msk [vmem:[%s2327_s23 + $0x48] sm:$0xff] %vm257_vm1, %v1196_v39  ;;  %1229 = vst.msk [vmem:[%s2327_s23 + $0x50] sm:$0xff] %vm257_vm1, %v1197_v42  ;;  %v1211_v35 = vmul.f32 %v1186_v12, %v1173_v60  ;;  %v1212_v40 = vmul.f32 %v1186_v12, %v1174_v2  ;;  %v1213_v44 = vmul.f32 %v1186_v12, %v1175_v57 }
 0x4e7   : > { %1230 = vst.msk [vmem:[%s2327_s23 + $0x58] sm:$0xff] %vm257_vm1, %v1198_v45  ;;  %1231 = vst.msk [vmem:[%s2327_s23 + $0x60] sm:$0xff] %vm257_vm1, %v1199_v48  ;;  %v1214_v19 = vmul.f32 %v1186_v12, %v1176_v47  ;;  %v1215_v50 = vmul.f32 %v1186_v12, %v1177_v34  ;;  %v1216_v55 = vmul.f32 %v1186_v12, %v1178_v29 }
 0x4e8   : > { %1232 = vst.msk [vmem:[%s2327_s23 + $0x68] sm:$0xff] %vm257_vm1, %v1200_v51  ;;  %1233 = vst.msk [vmem:[%s2327_s23 + $0x70] sm:$0xff] %vm257_vm1, %v1201_v3  ;;  %v1217_v59 = vmul.f32 %v1186_v12, %v1179_v18  ;;  %v1218_v62 = vmul.f32 %v1186_v12, %v1180_v58 }
 0x4e9   : > { %1234 = vst.msk [vmem:[%s2327_s23 + $0x78] sm:$0xff] %vm257_vm1, %v1202_v26  ;;  %1235 = vst.msk [vmem:[%s2327_s23 + $0x80] sm:$0xff] %vm257_vm1, %v1203_v52 }
 0x4ea   : > { %1236 = vst.msk [vmem:[%s2327_s23 + $0x88] sm:$0xff] %vm257_vm1, %v1204_v56  ;;  %1237 = vst.msk [vmem:[%s2327_s23 + $0x90] sm:$0xff] %vm257_vm1, %v1205_v61 }
 0x4eb   : > { %1238 = vst.msk [vmem:[%s2327_s23 + $0x98] sm:$0xff] %vm257_vm1, %v1206_v1  ;;  %1239 = vst.msk [vmem:[%s2327_s23 + $0xa0] sm:$0xff] %vm257_vm1, %v1207_v14 }
 0x4ec   : > { %1240 = vst.msk [vmem:[%s2327_s23 + $0xa8] sm:$0xff] %vm257_vm1, %v1208_v15  ;;  %1241 = vst.msk [vmem:[%s2327_s23 + $0xb0] sm:$0xff] %vm257_vm1, %v1209_v23 }
 0x4ed   : > { %1242 = vst.msk [vmem:[%s2327_s23 + $0xb8] sm:$0xff] %vm257_vm1, %v1210_v27  ;;  %1243 = vst.msk [vmem:[%s2327_s23 + $0xc0] sm:$0xff] %vm257_vm1, %v1211_v35 }
 0x4ee   : > { %1244 = vst.msk [vmem:[%s2327_s23 + $0xc8] sm:$0xff] %vm257_vm1, %v1212_v40  ;;  %1245 = vst.msk [vmem:[%s2327_s23 + $0xd0] sm:$0xff] %vm257_vm1, %v1213_v44 }
 0x4ef   : > { %1246 = vst.msk [vmem:[%s2327_s23 + $0xd8] sm:$0xff] %vm257_vm1, %v1214_v19  ;;  %1247 = vst.msk [vmem:[%s2327_s23 + $0xe0] sm:$0xff] %vm257_vm1, %v1215_v50 }
 0x4f0   : > { %1248 = vst.msk [vmem:[%s2327_s23 + $0xe8] sm:$0xff] %vm257_vm1, %v1216_v55  ;;  %1249 = vst.msk [vmem:[%s2327_s23 + $0xf0] sm:$0xff] %vm257_vm1, %v1217_v59 }
 0x4f1   : > { %1250 = vst.msk [vmem:[%s2327_s23 + $0xf8] sm:$0xff] %vm257_vm1, %v1218_v62 }
 0x4f2 PF: > { %s15_s18 = sadd.s32 1, %s1628_s18  }
 0x4f3   : > { %p12_p4 = scmp.ge.s32.totalorder %s15_s18, 4  }
 0x4f5   :  { %14 = sbr.rel (!%p12_p4) target bundleno = 1 (0x1), region = 70 }

</bundles_post_ra>
